<compile_context>
chip_gen: v7x
topology: tpu7x:2x2x1
jax: 0.10.0
libtpu: 0.0.40
codegen_flags: <defaults>
</compile_context>

<pallas_src>
import functools

import numpy as np
import jax
import jax.numpy as jnp
from jax import lax
from jax.experimental import pallas as pl
from jax.experimental.pallas import tpu as pltpu


def _round_up(x, m):
    return ((x + m - 1) // m) * m


def _cdiv(a, b):
    return -(-a // b)


# ---------------------------------------------------------------------------
# Pallas kernel: one tile of frames (true+pred fused) per grid step.
# ---------------------------------------------------------------------------
def _sss_kernel(sig_ref, basis_ref, lin_ref, log_ref, acc_ref, *,
                frame_tile, strip_rows, n_chunks, hop, n_freq, sin_off,
                n_frames, tiles_per_split, eps):
    s = pl.program_id(0)          # split axis (only >1 on v7x megacore)
    b = pl.program_id(1)          # batch item
    i = pl.program_id(2)          # frame tile within this split

    # Zero this split's resident accumulator blocks on its first visit.
    @pl.when(jnp.logical_and(b == 0, i == 0))
    def _init():
        lin_ref[...] = jnp.zeros_like(lin_ref)
        log_ref[...] = jnp.zeros_like(log_ref)

    tile_id = s * tiles_per_split + i
    first_frame = tile_id * frame_tile
    m_fused = strip_rows + frame_tile     # true frames + junk halo + pred frames

    @pl.when(first_frame < n_frames)          # skip pure-padding tiles
    def _compute():
        # Chunked windowed real-DFT, true & pred fused along M.
        #   output row r       (r <  frame_tile)            -> true frame r
        #   output row r       (strip_rows <= r)            -> pred frame r-strip_rows
        # Each chunk is ONE matmul over a single contiguous ref slice; the
        # partial products accumulate into a VMEM scratch ref (acc_ref).
        acc_ref[...] = jnp.dot(sig_ref[0:m_fused, :], basis_ref[0:hop, :],
                               preferred_element_type=jnp.float32)
        for c in range(1, n_chunks):                          # static unroll
            acc_ref[...] += jnp.dot(sig_ref[c:c + m_fused, :],
                                    basis_ref[c * hop:(c + 1) * hop, :],
                                    preferred_element_type=jnp.float32)

        st = acc_ref[0:frame_tile, :]                          # true  (ft, n_cols)
        sp = acc_ref[strip_rows:strip_rows + frame_tile, :]    # pred  (ft, n_cols)

        # Power spectrograms (Spectrogram default power=2.0).  cos at columns
        # [0, n_freq), sin at [sin_off, sin_off + n_freq) (packed when
        # 2*n_freq <= 128, lane-aligned otherwise).
        s_true = (st[:, 0:n_freq] * st[:, 0:n_freq]
                  + st[:, sin_off:sin_off + n_freq] * st[:, sin_off:sin_off + n_freq])
        s_pred = (sp[:, 0:n_freq] * sp[:, 0:n_freq]
                  + sp[:, sin_off:sin_off + n_freq] * sp[:, sin_off:sin_off + n_freq])

        lin_e = jnp.abs(s_pred - s_true)
        # Same EUP cost either way; keep the reference's exact form.
        log_e = jnp.abs(jnp.log2(s_true + eps) - jnp.log2(s_pred + eps))

        # Mask tile-padding frames (frame index >= n_frames).
        fid = first_frame + lax.broadcasted_iota(jnp.int32, (frame_tile, 1), 0)
        valid = fid < n_frames
        lin_e = jnp.where(valid, lin_e, 0.0)
        log_e = jnp.where(valid, log_e, 0.0)

        # Reduce only the frame axis (VPU adds) into the resident accumulators;
        # the cross-lane reduce happens once, outside the kernel.
        lin_ref[...] += jnp.sum(lin_e.reshape(frame_tile // 8, 8, n_freq), axis=0)
        log_ref[...] += jnp.sum(log_e.reshape(frame_tile // 8, 8, n_freq), axis=0)


# ---------------------------------------------------------------------------
# Host-side helpers.
# ---------------------------------------------------------------------------
def _device_info():
    """(physical VMEM bytes, #TensorCores/chip) with conservative fallbacks."""
    vmem_cap = 64 << 20
    try:
        vmem_cap = int(pltpu.get_tpu_info().vmem_capacity_bytes)
    except Exception:
        pass
    kind = ""
    try:
        kind = jax.devices()[0].device_kind.lower()
    except Exception:
        pass
    num_tc = 2 if ("v7" in kind or "7x" in kind) else 1   # v7x: 2 TCs/chip
    return vmem_cap, num_tc


def _windowed_dft_basis(n_fft, kpad, n_freq, sin_off, n_cols):
    """[hann*cos | hann*(-sin)] with rows padded to kpad, cols packed/padded."""
    n_i = jnp.arange(n_fft, dtype=jnp.int32)[:, None]
    k_i = jnp.arange(n_freq, dtype=jnp.int32)[None, :]
    # Exact integer argument reduction keeps f32 trig accurate for large n_fft.
    ang = (2.0 * np.pi / n_fft) * ((n_i * k_i) % n_fft).astype(jnp.float32)
    win = 0.5 - 0.5 * jnp.cos(
        (2.0 * np.pi / n_fft) * jnp.arange(n_fft, dtype=jnp.float32))
    cos_b = win[:, None] * jnp.cos(ang)
    sin_b = win[:, None] * (-jnp.sin(ang))
    basis = jnp.zeros((kpad, n_cols), jnp.float32)
    basis = basis.at[:n_fft, :n_freq].set(cos_b)
    basis = basis.at[:n_fft, sin_off:sin_off + n_freq].set(sin_b)
    return basis


def _plan(frame_tile, n_frames, n_chunks, hop, lp, kpad, n_cols, n_freq, num_tc):
    n_tiles = _cdiv(n_frames, frame_tile)
    n_splits = num_tc if n_tiles >= num_tc else 1
    tiles_per_split = _cdiv(n_tiles, n_splits)
    n_tiles_pad = n_splits * tiles_per_split
    halo = _round_up(max(n_chunks - 1, 0), 8)
    strip_rows = frame_tile + halo
    m_fused = strip_rows + frame_tile
    total_rows = max(_cdiv(lp, hop), (n_tiles_pad - 1) * frame_tile + strip_rows)

    def tile_bytes(r, c, itemsize=4):
        # Real VMEM footprint of an (r, c) f32 buffer: (8, 128)-tiled layout.
        return _round_up(max(r, 1), 8) * _round_up(max(c, 1), 128) * itemsize

    vmem_est = (
        2 * tile_bytes(2 * strip_rows, hop)        # stacked signal strip, 2 bufs
        + 2 * tile_bytes(kpad, n_cols)             # fused DFT basis, 2 bufs
        + 4 * tile_bytes(8, n_freq)                # resident lin/log accumulators
        + tile_bytes(m_fused, n_cols)              # acc scratch ref
        + tile_bytes(m_fused, n_cols)              # matmul result temp
        + 8 * tile_bytes(frame_tile, n_freq))      # st/sp/power/lin/log temps
    return dict(n_splits=n_splits, tiles_per_split=tiles_per_split,
                n_tiles_pad=n_tiles_pad, strip_rows=strip_rows,
                m_fused=m_fused, total_rows=total_rows, vmem_est=vmem_est)


def sss_loss(x_true, x_pred, n_fft=111, alpha=1.0, overlap=0.75, eps=1e-7,
             frame_tile=None):
    """Scalar single-scale spectral loss == SSSLoss.forward(...)['loss']."""
    min_len = min(int(x_true.shape[-1]), int(x_pred.shape[-1]))
    x_true = x_true[:, -min_len:].astype(jnp.float32)
    x_pred = x_pred[:, -min_len:].astype(jnp.float32)
    batch = int(x_true.shape[0])

    hop = int(n_fft * (1 - overlap))
    assert hop >= 1, "overlap too large"
    pad = n_fft // 2
    assert min_len > pad, (
        "signal too short for reflect padding (torch.stft constraint)")

    lp = min_len + 2 * pad
    n_frames = 1 + (lp - n_fft) // hop
    n_freq = n_fft // 2 + 1
    n_chunks = _cdiv(n_fft, hop)
    kpad = n_chunks * hop

    # cos|sin column packing: single 128-lane block whenever both halves fit,
    # otherwise the lane-aligned two-block layout.
    sin_off = n_freq if 2 * n_freq <= 128 else _round_up(n_freq, 128)
    n_cols = _round_up(sin_off + n_freq, 128)

    vmem_cap, num_tc = _device_info()
    budget = min(max(vmem_cap - (16 << 20), 8 << 20), 28 << 20)

    # ---- frame-tile selection under an accurate, layout-aware VMEM budget ----
    cands = ([max(8, _round_up(int(frame_tile), 8))] if frame_tile is not None
             else [256, 128, 64, 32, 16, 8])
    ft_sel, plan = None, None
    for t in cands:
        ft_sel = min(t, _round_up(n_frames, 8))
        plan = _plan(ft_sel, n_frames, n_chunks, hop, lp, kpad, n_cols, n_freq,
                     num_tc)
        if plan["vmem_est"] <= budget:
            break
    frame_tile = ft_sel
    strip_rows = plan["strip_rows"]
    total_rows = plan["total_rows"]
    n_tiles_pad = plan["n_tiles_pad"]
    tps = plan["tiles_per_split"]

    # ---- host-side: hop-wide rows -> per-tile strips (frame_tile + halo) ----
    row_idx = jnp.asarray(
        (np.arange(n_tiles_pad) * frame_tile)[:, None]
        + np.arange(strip_rows)[None, :], dtype=jnp.int32)

    def strips(x):
        xp = jnp.pad(x, ((0, 0), (pad, pad)), mode="reflect")
        xp = jnp.pad(xp, ((0, 0), (0, total_rows * hop - lp)))   # zero tail
        rows = xp.reshape(batch, total_rows, hop)
        return rows[:, row_idx, :]           # (B, n_tiles_pad, strip_rows, hop)

    # true rows [0, strip_rows), pred rows [strip_rows, 2*strip_rows) per tile.
    stacked = jnp.concatenate([strips(x_true), strips(x_pred)], axis=2)
    basis = _windowed_dft_basis(n_fft, kpad, n_freq, sin_off, n_cols)

    kernel = functools.partial(
        _sss_kernel,
        frame_tile=frame_tile, strip_rows=strip_rows, n_chunks=n_chunks,
        hop=hop, n_freq=n_freq, sin_off=sin_off, n_frames=n_frames,
        tiles_per_split=tps, eps=float(eps))

    grid = (plan["n_splits"], batch, tps)

    cp_kwargs = dict(dimension_semantics=("parallel", "arbitrary", "arbitrary"))
    if plan["vmem_est"] > (12 << 20):
        # Raise the scoped limit only when needed; never above the chip's
        # physical per-core VMEM (64 MiB on v7x).
        cp_kwargs["vmem_limit_bytes"] = int(
            min(2 * plan["vmem_est"] + (4 << 20),
                max(vmem_cap - (4 << 20), 16 << 20)))

    lin_part, log_part = pl.pallas_call(
        kernel,
        out_shape=(
            jax.ShapeDtypeStruct((plan["n_splits"], 8, n_freq), jnp.float32),
            jax.ShapeDtypeStruct((plan["n_splits"], 8, n_freq), jnp.float32),
        ),
        grid_spec=pltpu.PrefetchScalarGridSpec(
            num_scalar_prefetch=0,
            grid=grid,
            in_specs=[
                pl.BlockSpec((None, None, 2 * strip_rows, hop),
                             lambda s, b, i: (b, s * tps + i, 0, 0)),
                pl.BlockSpec((kpad, n_cols), lambda s, b, i: (0, 0)),
            ],
            out_specs=(
                pl.BlockSpec((None, 8, n_freq), lambda s, b, i: (s, 0, 0)),
                pl.BlockSpec((None, 8, n_freq), lambda s, b, i: (s, 0, 0)),
            ),
            scratch_shapes=[pltpu.VMEM((plan["m_fused"], n_cols), jnp.float32)],
        ),
        compiler_params=pltpu.CompilerParams(**cp_kwargs),
    )(stacked, basis)

    denom = float(batch * n_frames * n_freq)     # F.l1_loss 'mean' denominator
    lin_term = jnp.sum(lin_part) / denom
    log_term = jnp.sum(log_part) / denom
    return lin_term + alpha * log_term


def sss_loss_forward(x_true, x_pred, **kwargs):
    """Mirrors SSSLoss.forward: returns {'loss': scalar}."""
    return {"loss": sss_loss(x_true, x_pred, **kwargs)}


# ---------------------------------------------------------------------------
# Pure-JAX reference (independent framing / windowing / DFT path).
# ---------------------------------------------------------------------------
def sss_loss_ref(x_true, x_pred, n_fft=111, alpha=1.0, overlap=0.75, eps=1e-7):
    min_len = min(int(x_true.shape[-1]), int(x_pred.shape[-1]))
    xt = x_true[:, -min_len:].astype(jnp.float32)
    xp = x_pred[:, -min_len:].astype(jnp.float32)
    hop = int(n_fft * (1 - overlap))
    pad = n_fft // 2
    n_freq = n_fft // 2 + 1

    win = 0.5 - 0.5 * jnp.cos(
        2.0 * jnp.pi * jnp.arange(n_fft, dtype=jnp.float32) / n_fft)
    n = jnp.arange(n_fft, dtype=jnp.float32)[:, None]
    k = jnp.arange(n_freq, dtype=jnp.float32)[None, :]
    ang = 2.0 * jnp.pi * n * k / n_fft
    cos_b, sin_b = jnp.cos(ang), -jnp.sin(ang)

    def spec(x):
        z = jnp.pad(x, ((0, 0), (pad, pad)), mode="reflect")
        nf = 1 + (z.shape[1] - n_fft) // hop
        idx = jnp.arange(nf)[:, None] * hop + jnp.arange(n_fft)[None, :]
        frames = z[:, idx] * win
        re = frames @ cos_b
        im = frames @ sin_b
        return re * re + im * im

    s_t, s_p = spec(xt), spec(xp)
    lin = jnp.mean(jnp.abs(s_p - s_t))
    log = jnp.mean(jnp.abs(jnp.log2(s_t + eps) - jnp.log2(s_p + eps)))
    return lin + alpha * log


if __name__ == "__main__":
    key = jax.random.PRNGKey(0)
    k1, k2 = jax.random.split(key)
    B, L = 2, 1024
    x_true = jax.random.normal(k1, (B, L), dtype=jnp.float32)
    x_pred = jax.random.normal(k2, (B, L), dtype=jnp.float32)

    # n_fft=111: the module's default (odd n_fft, hop=27, packed cos|sin block).
    # n_fft=64 / frame_tile=16: exercises the multi-tile path.
    cases = [dict(n_fft=111, frame_tile=None),
             dict(n_fft=64, frame_tile=16)]

    for cfg in cases:
        out = sss_loss_forward(x_true, x_pred, n_fft=cfg["n_fft"],
                               frame_tile=cfg["frame_tile"])
        loss = jax.block_until_ready(out["loss"])
        ref = jax.block_until_ready(
            sss_loss_ref(x_true, x_pred, n_fft=cfg["n_fft"]))
        assert np.allclose(np.asarray(loss), np.asarray(ref),
                           rtol=1e-2, atol=1e-4), (cfg, float(loss), float(ref))

    print("KERNEL_OK")
</pallas_src>

<mosaic_0001>
module attributes {stable_mosaic.version = 11 : i64} {
  func.func @_sss_kernel(%arg0: i32, %arg1: i32, %arg2: i32, %arg3: memref<1x1x96x27xf32, #tpu.memory_space<vmem>>, %arg4: memref<135x128xf32, #tpu.memory_space<vmem>>, %arg5: memref<1x8x56xf32, #tpu.memory_space<vmem>>, %arg6: memref<1x8x56xf32, #tpu.memory_space<vmem>>, %arg7: memref<88x128xf32, #tpu.memory_space<vmem>>) attributes {dimension_semantics = [#tpu.dimension_semantics<parallel>, #tpu.dimension_semantics<arbitrary>, #tpu.dimension_semantics<arbitrary>], iteration_bounds = array<i64: 1, 2, 1>, scalar_prefetch = 0 : i64, scratch_operands = 1 : i64, tpu.core_type = #tpu.core_type<tc>, window_params = [{transform_indices = @transform_0, window_bounds = array<i64: 1, 1, 96, 27>}, {pipeline_mode = #tpu.pipeline_mode<synchronous>, transform_indices = @transform_1, window_bounds = array<i64: 135, 128>}, {transform_indices = @transform_2, window_bounds = array<i64: 1, 8, 56>}, {transform_indices = @transform_3, window_bounds = array<i64: 1, 8, 56>}]} {
    %c0_i32 = arith.constant 0 : i32
    %0 = arith.cmpi eq, %arg1, %c0_i32 : i32
    %c0_i32_0 = arith.constant 0 : i32
    %1 = arith.cmpi eq, %arg2, %c0_i32_0 : i32
    %2 = arith.andi %0, %1 : i1
    %3 = arith.extui %2 : i1 to i32
    %c0_i32_1 = arith.constant 0 : i32
    %4 = arith.cmpi ne, %3, %c0_i32_1 : i32
    scf.if %4 {
      %cst = arith.constant 0.000000e+00 : f32
      %11 = vector.broadcast %cst : f32 to vector<8x56xf32>
      %c0 = arith.constant 0 : index
      %c0_3 = arith.constant 0 : index
      %c0_4 = arith.constant 0 : index
      %12 = vector.load %arg5[%c0, %c0_3, %c0_4] : memref<1x8x56xf32, #tpu.memory_space<vmem>>, vector<1x8x56xf32>
      %13 = vector.shape_cast %12 : vector<1x8x56xf32> to vector<8x56xf32>
      %14 = vector.shape_cast %11 : vector<8x56xf32> to vector<1x8x56xf32>
      tpu.vector_store %arg5[%c0, %c0_3, %c0_4], %14 {strides = array<i32>} : memref<1x8x56xf32, #tpu.memory_space<vmem>>, vector<1x8x56xf32>,
      %cst_5 = arith.constant 0.000000e+00 : f32
      %15 = vector.broadcast %cst_5 : f32 to vector<8x56xf32>
      %c0_6 = arith.constant 0 : index
      %c0_7 = arith.constant 0 : index
      %c0_8 = arith.constant 0 : index
      %16 = vector.load %arg6[%c0_6, %c0_7, %c0_8] : memref<1x8x56xf32, #tpu.memory_space<vmem>>, vector<1x8x56xf32>
      %17 = vector.shape_cast %16 : vector<1x8x56xf32> to vector<8x56xf32>
      %18 = vector.shape_cast %15 : vector<8x56xf32> to vector<1x8x56xf32>
      tpu.vector_store %arg6[%c0_6, %c0_7, %c0_8], %18 {strides = array<i32>} : memref<1x8x56xf32, #tpu.memory_space<vmem>>, vector<1x8x56xf32>,
    } else {
    }
    %c1_i32 = arith.constant 1 : i32
    %5 = arith.muli %arg0, %c1_i32 : i32
    %6 = arith.addi %5, %arg2 : i32
    %c40_i32 = arith.constant 40 : i32
    %7 = arith.muli %6, %c40_i32 : i32
    %c38_i32 = arith.constant 38 : i32
    %8 = arith.cmpi slt, %7, %c38_i32 : i32
    %9 = arith.extui %8 : i1 to i32
    %c0_i32_2 = arith.constant 0 : i32
    %10 = arith.cmpi ne, %9, %c0_i32_2 : i32
    scf.if %10 {
      %c0 = arith.constant 0 : index
      %c0_3 = arith.constant 0 : index
      %c0_4 = arith.constant 0 : index
      %c0_5 = arith.constant 0 : index
      %11 = vector.load %arg3[%c0, %c0_3, %c0_4, %c0_5] : memref<1x1x96x27xf32, #tpu.memory_space<vmem>>, vector<1x1x88x27xf32>
      %12 = vector.shape_cast %11 : vector<1x1x88x27xf32> to vector<88x27xf32>
      %c0_6 = arith.constant 0 : index
      %c0_7 = arith.constant 0 : index
      %13 = vector.load %arg4[%c0_6, %c0_7] : memref<135x128xf32, #tpu.memory_space<vmem>>, vector<27x128xf32>
      %cst = arith.constant dense<0.000000e+00> : vector<88x128xf32>
      %14 = tpu.matmul %12, %13, %cst {dimension_numbers = #tpu.dot_dimension_numbers<[1], [0], [0], [1], [0, 0, 1, 1], [], []>} : vector<88x27xf32>, vector<27x128xf32>, vector<88x128xf32> -> vector<88x128xf32>
      %c0_8 = arith.constant 0 : index
      %c0_9 = arith.constant 0 : index
      %15 = vector.load %arg7[%c0_8, %c0_9] : memref<88x128xf32, #tpu.memory_space<vmem>>, vector<88x128xf32>
      tpu.vector_store %arg7[%c0_8, %c0_9], %14 {strides = array<i32>} : memref<88x128xf32, #tpu.memory_space<vmem>>, vector<88x128xf32>,
      %c0_10 = arith.constant 0 : index
      %c0_11 = arith.constant 0 : index
      %16 = vector.load %arg7[%c0_10, %c0_11] : memref<88x128xf32, #tpu.memory_space<vmem>>, vector<88x128xf32>
      %c0_12 = arith.constant 0 : index
      %c0_13 = arith.constant 0 : index
      %c1 = arith.constant 1 : index
      %c0_14 = arith.constant 0 : index
      %17 = vector.load %arg3[%c0_12, %c0_13, %c1, %c0_14] : memref<1x1x96x27xf32, #tpu.memory_space<vmem>>, vector<1x1x88x27xf32>
      %18 = vector.shape_cast %17 : vector<1x1x88x27xf32> to vector<88x27xf32>
      %c27 = arith.constant 27 : index
      %c0_15 = arith.constant 0 : index
      %19 = vector.load %arg4[%c27, %c0_15] : memref<135x128xf32, #tpu.memory_space<vmem>>, vector<27x128xf32>
      %cst_16 = arith.constant dense<0.000000e+00> : vector<88x128xf32>
      %20 = tpu.matmul %18, %19, %cst_16 {dimension_numbers = #tpu.dot_dimension_numbers<[1], [0], [0], [1], [0, 0, 1, 1], [], []>} : vector<88x27xf32>, vector<27x128xf32>, vector<88x128xf32> -> vector<88x128xf32>
      %21 = arith.addf %16, %20 : vector<88x128xf32>
      %c0_17 = arith.constant 0 : index
      %c0_18 = arith.constant 0 : index
      %22 = vector.load %arg7[%c0_17, %c0_18] : memref<88x128xf32, #tpu.memory_space<vmem>>, vector<88x128xf32>
      tpu.vector_store %arg7[%c0_17, %c0_18], %21 {strides = array<i32>} : memref<88x128xf32, #tpu.memory_space<vmem>>, vector<88x128xf32>,
      %c0_19 = arith.constant 0 : index
      %c0_20 = arith.constant 0 : index
      %23 = vector.load %arg7[%c0_19, %c0_20] : memref<88x128xf32, #tpu.memory_space<vmem>>, vector<88x128xf32>
      %c0_21 = arith.constant 0 : index
      %c0_22 = arith.constant 0 : index
      %c2 = arith.constant 2 : index
      %c0_23 = arith.constant 0 : index
      %24 = vector.load %arg3[%c0_21, %c0_22, %c2, %c0_23] : memref<1x1x96x27xf32, #tpu.memory_space<vmem>>, vector<1x1x88x27xf32>
      %25 = vector.shape_cast %24 : vector<1x1x88x27xf32> to vector<88x27xf32>
      %c54 = arith.constant 54 : index
      %c0_24 = arith.constant 0 : index
      %26 = vector.load %arg4[%c54, %c0_24] : memref<135x128xf32, #tpu.memory_space<vmem>>, vector<27x128xf32>
      %cst_25 = arith.constant dense<0.000000e+00> : vector<88x128xf32>
      %27 = tpu.matmul %25, %26, %cst_25 {dimension_numbers = #tpu.dot_dimension_numbers<[1], [0], [0], [1], [0, 0, 1, 1], [], []>} : vector<88x27xf32>, vector<27x128xf32>, vector<88x128xf32> -> vector<88x128xf32>
      %28 = arith.addf %23, %27 : vector<88x128xf32>
      %c0_26 = arith.constant 0 : index
      %c0_27 = arith.constant 0 : index
      %29 = vector.load %arg7[%c0_26, %c0_27] : memref<88x128xf32, #tpu.memory_space<vmem>>, vector<88x128xf32>
      tpu.vector_store %arg7[%c0_26, %c0_27], %28 {strides = array<i32>} : memref<88x128xf32, #tpu.memory_space<vmem>>, vector<88x128xf32>,
      %c0_28 = arith.constant 0 : index
      %c0_29 = arith.constant 0 : index
      %30 = vector.load %arg7[%c0_28, %c0_29] : memref<88x128xf32, #tpu.memory_space<vmem>>, vector<88x128xf32>
      %c0_30 = arith.constant 0 : index
      %c0_31 = arith.constant 0 : index
      %c3 = arith.constant 3 : index
      %c0_32 = arith.constant 0 : index
      %31 = vector.load %arg3[%c0_30, %c0_31, %c3, %c0_32] : memref<1x1x96x27xf32, #tpu.memory_space<vmem>>, vector<1x1x88x27xf32>
      %32 = vector.shape_cast %31 : vector<1x1x88x27xf32> to vector<88x27xf32>
      %c81 = arith.constant 81 : index
      %c0_33 = arith.constant 0 : index
      %33 = vector.load %arg4[%c81, %c0_33] : memref<135x128xf32, #tpu.memory_space<vmem>>, vector<27x128xf32>
      %cst_34 = arith.constant dense<0.000000e+00> : vector<88x128xf32>
      %34 = tpu.matmul %32, %33, %cst_34 {dimension_numbers = #tpu.dot_dimension_numbers<[1], [0], [0], [1], [0, 0, 1, 1], [], []>} : vector<88x27xf32>, vector<27x128xf32>, vector<88x128xf32> -> vector<88x128xf32>
      %35 = arith.addf %30, %34 : vector<88x128xf32>
      %c0_35 = arith.constant 0 : index
      %c0_36 = arith.constant 0 : index
      %36 = vector.load %arg7[%c0_35, %c0_36] : memref<88x128xf32, #tpu.memory_space<vmem>>, vector<88x128xf32>
      tpu.vector_store %arg7[%c0_35, %c0_36], %35 {strides = array<i32>} : memref<88x128xf32, #tpu.memory_space<vmem>>, vector<88x128xf32>,
      %c0_37 = arith.constant 0 : index
      %c0_38 = arith.constant 0 : index
      %37 = vector.load %arg7[%c0_37, %c0_38] : memref<88x128xf32, #tpu.memory_space<vmem>>, vector<88x128xf32>
      %c0_39 = arith.constant 0 : index
      %c0_40 = arith.constant 0 : index
      %c4 = arith.constant 4 : index
      %c0_41 = arith.constant 0 : index
      %38 = vector.load %arg3[%c0_39, %c0_40, %c4, %c0_41] : memref<1x1x96x27xf32, #tpu.memory_space<vmem>>, vector<1x1x88x27xf32>
      %39 = vector.shape_cast %38 : vector<1x1x88x27xf32> to vector<88x27xf32>
      %c108 = arith.constant 108 : index
      %c0_42 = arith.constant 0 : index
      %40 = vector.load %arg4[%c108, %c0_42] : memref<135x128xf32, #tpu.memory_space<vmem>>, vector<27x128xf32>
      %cst_43 = arith.constant dense<0.000000e+00> : vector<88x128xf32>
      %41 = tpu.matmul %39, %40, %cst_43 {dimension_numbers = #tpu.dot_dimension_numbers<[1], [0], [0], [1], [0, 0, 1, 1], [], []>} : vector<88x27xf32>, vector<27x128xf32>, vector<88x128xf32> -> vector<88x128xf32>
      %42 = arith.addf %37, %41 : vector<88x128xf32>
      %c0_44 = arith.constant 0 : index
      %c0_45 = arith.constant 0 : index
      %43 = vector.load %arg7[%c0_44, %c0_45] : memref<88x128xf32, #tpu.memory_space<vmem>>, vector<88x128xf32>
      tpu.vector_store %arg7[%c0_44, %c0_45], %42 {strides = array<i32>} : memref<88x128xf32, #tpu.memory_space<vmem>>, vector<88x128xf32>,
      %c0_46 = arith.constant 0 : index
      %c0_47 = arith.constant 0 : index
      %44 = vector.load %arg7[%c0_46, %c0_47] : memref<88x128xf32, #tpu.memory_space<vmem>>, vector<40x128xf32>
      %c48 = arith.constant 48 : index
      %c0_48 = arith.constant 0 : index
      %45 = vector.load %arg7[%c48, %c0_48] : memref<88x128xf32, #tpu.memory_space<vmem>>, vector<40x128xf32>
      %46 = vector.extract_strided_slice %44 {offsets = [0, 0], sizes = [40, 56], strides = [1, 1]} : vector<40x128xf32> to vector<40x56xf32>
      %47 = vector.extract_strided_slice %44 {offsets = [0, 0], sizes = [40, 56], strides = [1, 1]} : vector<40x128xf32> to vector<40x56xf32>
      %48 = arith.mulf %46, %47 : vector<40x56xf32>
      %49 = vector.extract_strided_slice %44 {offsets = [0, 56], sizes = [40, 56], strides = [1, 1]} : vector<40x128xf32> to vector<40x56xf32>
      %50 = vector.extract_strided_slice %44 {offsets = [0, 56], sizes = [40, 56], strides = [1, 1]} : vector<40x128xf32> to vector<40x56xf32>
      %51 = arith.mulf %49, %50 : vector<40x56xf32>
      %52 = arith.addf %48, %51 : vector<40x56xf32>
      %53 = vector.extract_strided_slice %45 {offsets = [0, 0], sizes = [40, 56], strides = [1, 1]} : vector<40x128xf32> to vector<40x56xf32>
      %54 = vector.extract_strided_slice %45 {offsets = [0, 0], sizes = [40, 56], strides = [1, 1]} : vector<40x128xf32> to vector<40x56xf32>
      %55 = arith.mulf %53, %54 : vector<40x56xf32>
      %56 = vector.extract_strided_slice %45 {offsets = [0, 56], sizes = [40, 56], strides = [1, 1]} : vector<40x128xf32> to vector<40x56xf32>
      %57 = vector.extract_strided_slice %45 {offsets = [0, 56], sizes = [40, 56], strides = [1, 1]} : vector<40x128xf32> to vector<40x56xf32>
      %58 = arith.mulf %56, %57 : vector<40x56xf32>
      %59 = arith.addf %55, %58 : vector<40x56xf32>
      %60 = arith.subf %59, %52 : vector<40x56xf32>
      %61 = math.absf %60 : vector<40x56xf32>
      %cst_49 = arith.constant 1.000000e-07 : f32
      %62 = vector.broadcast %cst_49 : f32 to vector<40x56xf32>
      %63 = arith.addf %52, %62 : vector<40x56xf32>
      %64 = math.log %63 : vector<40x56xf32>
      %cst_50 = arith.constant 2.000000e+00 : f32
      %65 = math.log %cst_50 : f32
      %66 = vector.broadcast %65 : f32 to vector<40x56xf32>
      %67 = arith.divf %64, %66 : vector<40x56xf32>
      %cst_51 = arith.constant 1.000000e-07 : f32
      %68 = vector.broadcast %cst_51 : f32 to vector<40x56xf32>
      %69 = arith.addf %59, %68 : vector<40x56xf32>
      %70 = math.log %69 : vector<40x56xf32>
      %cst_52 = arith.constant 2.000000e+00 : f32
      %71 = math.log %cst_52 : f32
      %72 = vector.broadcast %71 : f32 to vector<40x56xf32>
      %73 = arith.divf %70, %72 : vector<40x56xf32>
      %74 = arith.subf %67, %73 : vector<40x56xf32>
      %75 = math.absf %74 : vector<40x56xf32>
      %76 = tpu.iota {dimensions = array<i32: 0>} : vector<40x1xi32>
      %77 = vector.broadcast %7 : i32 to vector<40x1xi32>
      %78 = arith.addi %77, %76 : vector<40x1xi32>
      %c38_i32_53 = arith.constant 38 : i32
      %79 = vector.broadcast %c38_i32_53 : i32 to vector<40x1xi32>
      %80 = arith.cmpi slt, %78, %79 : vector<40x1xi32>
      %cst_54 = arith.constant 0.000000e+00 : f32
      %81 = vector.shape_cast %80 : vector<40x1xi1> to vector<40x1xi1>
      %82 = vector.broadcast %81 : vector<40x1xi1> to vector<40x56xi1>
      %83 = vector.broadcast %cst_54 : f32 to vector<40x56xf32>
      %84 = arith.select %82, %61, %83 : vector<40x56xi1>, vector<40x56xf32>
      %cst_55 = arith.constant 0.000000e+00 : f32
      %85 = vector.shape_cast %80 : vector<40x1xi1> to vector<40x1xi1>
      %86 = vector.broadcast %85 : vector<40x1xi1> to vector<40x56xi1>
      %87 = vector.broadcast %cst_55 : f32 to vector<40x56xf32>
      %88 = arith.select %86, %75, %87 : vector<40x56xi1>, vector<40x56xf32>
      %c0_56 = arith.constant 0 : index
      %c0_57 = arith.constant 0 : index
      %c0_58 = arith.constant 0 : index
      %89 = vector.load %arg5[%c0_56, %c0_57, %c0_58] : memref<1x8x56xf32, #tpu.memory_space<vmem>>, vector<1x8x56xf32>
      %90 = vector.shape_cast %89 : vector<1x8x56xf32> to vector<8x56xf32>
      %91 = vector.shape_cast %84 : vector<40x56xf32> to vector<5x8x56xf32>
      %cst_59 = arith.constant dense<0.000000e+00> : vector<8x56xf32>
      %92 = vector.multi_reduction <add>, %91, %cst_59 [0] : vector<5x8x56xf32> to vector<8x56xf32>
      %93 = arith.addf %90, %92 : vector<8x56xf32>
      %c0_60 = arith.constant 0 : index
      %c0_61 = arith.constant 0 : index
      %c0_62 = arith.constant 0 : index
      %94 = vector.load %arg5[%c0_60, %c0_61, %c0_62] : memref<1x8x56xf32, #tpu.memory_space<vmem>>, vector<1x8x56xf32>
      %95 = vector.shape_cast %94 : vector<1x8x56xf32> to vector<8x56xf32>
      %96 = vector.shape_cast %93 : vector<8x56xf32> to vector<1x8x56xf32>
      tpu.vector_store %arg5[%c0_60, %c0_61, %c0_62], %96 {strides = array<i32>} : memref<1x8x56xf32, #tpu.memory_space<vmem>>, vector<1x8x56xf32>,
      %c0_63 = arith.constant 0 : index
      %c0_64 = arith.constant 0 : index
      %c0_65 = arith.constant 0 : index
      %97 = vector.load %arg6[%c0_63, %c0_64, %c0_65] : memref<1x8x56xf32, #tpu.memory_space<vmem>>, vector<1x8x56xf32>
      %98 = vector.shape_cast %97 : vector<1x8x56xf32> to vector<8x56xf32>
      %99 = vector.shape_cast %88 : vector<40x56xf32> to vector<5x8x56xf32>
      %cst_66 = arith.constant dense<0.000000e+00> : vector<8x56xf32>
      %100 = vector.multi_reduction <add>, %99, %cst_66 [0] : vector<5x8x56xf32> to vector<8x56xf32>
      %101 = arith.addf %98, %100 : vector<8x56xf32>
      %c0_67 = arith.constant 0 : index
      %c0_68 = arith.constant 0 : index
      %c0_69 = arith.constant 0 : index
      %102 = vector.load %arg6[%c0_67, %c0_68, %c0_69] : memref<1x8x56xf32, #tpu.memory_space<vmem>>, vector<1x8x56xf32>
      %103 = vector.shape_cast %102 : vector<1x8x56xf32> to vector<8x56xf32>
      %104 = vector.shape_cast %101 : vector<8x56xf32> to vector<1x8x56xf32>
      tpu.vector_store %arg6[%c0_67, %c0_68, %c0_69], %104 {strides = array<i32>} : memref<1x8x56xf32, #tpu.memory_space<vmem>>, vector<1x8x56xf32>,
    } else {
    }
    return
  }
  func.func @transform_0(%arg0: i32, %arg1: i32, %arg2: i32) -> (i32, i32, i32, i32) {
    %c1_i32 = arith.constant 1 : i32
    %0 = arith.muli %arg0, %c1_i32 : i32
    %1 = arith.addi %0, %arg2 : i32
    %c0_i32 = arith.constant 0 : i32
    %c0_i32_0 = arith.constant 0 : i32
    %c0_i32_1 = arith.constant 0 : i32
    return %arg1, %1, %c0_i32, %c0_i32_0 : i32, i32, i32, i32
  }
  func.func @transform_1(%arg0: i32, %arg1: i32, %arg2: i32) -> (i32, i32) {
    %c0_i32 = arith.constant 0 : i32
    %c0_i32_0 = arith.constant 0 : i32
    %c0_i32_1 = arith.constant 0 : i32
    return %c0_i32, %c0_i32_0 : i32, i32
  }
  func.func @transform_2(%arg0: i32, %arg1: i32, %arg2: i32) -> (i32, i32, i32) {
    %c0_i32 = arith.constant 0 : i32
    %c0_i32_0 = arith.constant 0 : i32
    %c0_i32_1 = arith.constant 0 : i32
    return %arg0, %c0_i32, %c0_i32_0 : i32, i32, i32
  }
  func.func @transform_3(%arg0: i32, %arg1: i32, %arg2: i32) -> (i32, i32, i32) {
    %c0_i32 = arith.constant 0 : i32
    %c0_i32_0 = arith.constant 0 : i32
    %c0_i32_1 = arith.constant 0 : i32
    return %arg0, %c0_i32, %c0_i32_0 : i32, i32, i32
  }
}

</mosaic_0001>

<bundles_post_ra>
// kernel: tpu_custom_call.1
= control target key start
LH: loop header
LB: loop body
LE: loop exit
PB: predicated region body
PF: predicated region fallthrough
CT: control target
= control target key end

     0   :  { %9 = vsyncpa [#allocation4], 0  ;;  %s2587_s0 = inlined_call_operand.vmem [shape: f32[2,1,96,27], index: 0, kind: input, shape index: {}]   ;;  %s2588_s1 = inlined_call_operand.vmem [shape: f32[135,128], index: 1, kind: input, shape index: {}]   ;;  %s2589_s2 = inlined_call_operand.hbm [shape: f32[1,8,56], index: 2, kind: output, shape index: {0}]   ;;  %s2590_s3 = inlined_call_operand.hbm [shape: f32[1,8,56], index: 3, kind: output, shape index: {1}]  }
   0x1   :  { %10 = vsyncpa [#allocation6], 0  ;;  %s2150_s12 = smov 0   ;;  %s2152_s13 = smov 0  }
   0x2   :  { %s2154_s14 = smov 0  }
   0x3 LB: > { %s1511_s15 = sadd.s32 4294967295, %s2120_s14   ;;  %s31_s16 = sadd.s32 1, %s2116_s13  ;;  %s2120_s14 = sphi %s2154_s14, %s16_s14   ;;  %s2116_s13 = sphi %s2152_s13, %s2595_s13   ;;  %s2112_s12 = sphi %s2150_s12, %s2594_s12  }
   0x4   : > { %p33_p0 = scmp.ge.s32.totalorder %s31_s16, 2  ;;  %p1514_p1 = scmp.ge.s32.totalorder %s2120_s14, 1 }
   0x5   : > { %p171_p2 = scmp.lt.s32.totalorder %s2120_s14, 3 }
   0x6   : > { %s2597_s16 = smov (%p33_p0, %s31_s16), 0 }
   0x7   : > { %p172_p3 = pnand %p1514_p1, %p171_p2 }
   0x8   : > { %p196_p4 = scmp.lt.s32.totalorder (!%p172_p3), %s2112_s12, 1  ;;  %p206_p5 = scmp.eq.s32.totalorder (!%p172_p3), %s2112_s12, 0 }
   0x9   : > { %175 = sbr.rel (%p172_p3) target bundleno = 530 (0x212), region = 28 }
  0x10   : > { %s2599_s12 = smov (!%p196_p4, %s2112_s12), 1  ;;  %211 = sbr.rel (!%p206_p5) target bundleno = 23 (0x17), region = 32 }
  0x11   : > { %s1973_s17 = smul.u32 96, %s2599_s12  ;;  %vm212_vm0 = vcmask (%p206_p5), 457728   ;;  %v2122_v0 = vmov (%p206_p5), 0.0  }
  0x12   : > { %213 = vst.msk [vmem:[#allocation3] sm:$0xff] (%p206_p5), %vm212_vm0, %v2122_v0  ;;  %214 = vst.msk [vmem:[#allocation5] sm:$0xff] (%p206_p5), %vm212_vm0, %v2122_v0 }
  0x13   : > { %s2172_s20 = scalar_lea.vmem %s2587_s0, %s1973_s17 }
  0x17 PF: > { %v232_v1 = vld [vmem:[%s2588_s1] sm:$0xff]  ;;  %v233_v2 = vld [vmem:[%s2588_s1 + $0x8] sm:$0xff]  ;;  %v631_v3 = vld [vmem:[%s2588_s1 + $0x36] sm:$0xff]  ;;  %vm270_vm1 = vcmask 1042432   ;;  %v2123_v4 = vmov 0.0|0.0   ;;  %vm2124_vm2 = vmmov 0  }
  0x18   : > { %1864 = vmatprep.subr.bf16.mxu1 %v2123_v4  ;;  %1878 = vmatprep.subr.bf16.mxu0 %v2123_v4  ;;  %v1865_v5 = vpack.c.bf16 %v233_v2, %v232_v1  ;;  %v632_v6 = vld [vmem:[%s2588_s1 + $0x3e] sm:$0xff]  ;;  %v234_v7 = vld [vmem:[%s2588_s1 + $0x10] sm:$0xff]  ;;  %v235_v8 = vld [vmem:[%s2588_s1 + $0x18] sm:$0x7]  ;;  %v2125_v12 = vmov 0.0   ;;  %vm2126_vm3 = vmmov 1  }
  0x19   : > { %v2194_v9 = vpack.c.bf16 %v632_v6, %v631_v3  ;;  %v633_v10 = vld [vmem:[%s2588_s1 + $0x46] sm:$0xff]  ;;  %v634_v11 = vld [vmem:[%s2588_s1 + $0x4e] sm:$0x7]  ;;  %1667 = vmatprep.mubr.msk.f32.mxu1 %vm2124_vm2, %v2125_v12  ;;  %1749 = vmatprep.mubr.msk.f32.mxu0 %vm2124_vm2, %v2125_v12  ;;  %v1868_v13 = vpack.c.bf16 %v235_v8, %v234_v7  ;;  %vm2209_vm4 = vmpackc.low %vm270_vm1, %vm2126_vm3  ;;  %vm236_vm5 = vcmask 220160   ;;  %vm1390_vm6 = vcmask 457728   ;;  %s2128_s12 = smov [#allocation3]  }
  0x1a   : > { %1866 = vmatpush3.bf16.msra.mxu1 %v1865_v5  ;;  %v2213_v15 = vpack.c.bf16 %v634_v11, %v633_v10  ;;  %v835_v16 = vld [vmem:[%s2588_s1 + $0x51] sm:$0xff]  ;;  %v836_v17 = vld [vmem:[%s2588_s1 + $0x59] sm:$0xff]  ;;  %v428_v19 = vld [vmem:[%s2588_s1 + $0x23] sm:$0xff]  ;;  %s1423_s17 = sshll.u32 %s2128_s12, 4  ;;  %p2521_p6 = scmp.eq.s32.totalorder %s1511_s15, 1  ;;  %s1424_s17 = int_to_ptr.vmem [resolvable:$true] %s1423_s17 }
  0x1b   : > { %1880 = vmatpush3.bf16.msra.mxu0 %v2194_v9  ;;  %1867 = vmatprep.subr.bf16.mxu1 %v2123_v4  ;;  %v427_v18 = vld [vmem:[%s2588_s1 + $0x1b] sm:$0xff]  ;;  %v1886_v22 = vpack.c.bf16 %v836_v17, %v835_v16  ;;  %v838_v25 = vld [vmem:[%s2588_s1 + $0x69] sm:$0x7]  ;;  %v430_v27 = vld [vmem:[%s2588_s1 + $0x33] sm:$0x7]  ;;  %s2038_s19 = scalar_lea.vmem %s1424_s17, 128  ;;  %p2045_p10 = scmp.lt.s32.totalorder %s1424_s17, %s1424_s17 }
  0x1c   : > { %1881 = vmatprep.subr.bf16.mxu0 %v2123_v4  ;;  %v221_v20 = vld [vmem:[%s2172_s20] sm:$0xff]  ;;  %v1872_v23 = vpack.c.bf16 %v428_v19, %v427_v18  ;;  %v429_v26 = vld [vmem:[%s2588_s1 + $0x2b] sm:$0xff]  ;;  %v224_v34 = vld [vmem:[%s2172_s20 + $0x18] sm:$0xff]  ;;  %p2039_p7 = scmp.ne.s32.totalorder %s1424_s17, %s2038_s19  ;;  %p2046_p11 = scmp.lt.s32.totalorder %s2038_s19, %s2038_s19 }
  0x1d   : > { %v620_v21 = vld [vmem:[%s2172_s20 + $0x2] sm:$0xff]  ;;  %v621_v29 = vld [vmem:[%s2172_s20 + $0xa] sm:$0xff]  ;;  %v1875_v31 = vpack.c.bf16 %v430_v27, %v429_v26  ;;  %v622_v33 = vld [vmem:[%s2172_s20 + $0x12] sm:$0xff] }
  0x1e   : > { %1870 = vmatpush3.bf16.msk.msra.mxu1 %vm2209_vm4, %v1868_v13  ;;  %v837_v24 = vld [vmem:[%s2588_s1 + $0x61] sm:$0xff]  ;;  %v223_v32 = vld [vmem:[%s2172_s20 + $0x10] sm:$0xff]  ;;  %v228_v47 = vld [vmem:[%s2172_s20 + $0x38] sm:$0xff]  ;;  %p2040_p8 = pnand %p2039_p7, %p2521_p6  ;;  %p2047_p12 = por %p2046_p11, %p2045_p10 }
  0x1f   : > { %1884 = vmatpush3.bf16.msk.msra.mxu0 %vm2209_vm4, %v2213_v15  ;;  %1871 = vmatprep.subr.bf16.mxu1 %v2123_v4  ;;  %v222_v28 = vld [vmem:[%s2172_s20 + $0x8] sm:$0xff]  ;;  %v1889_v30 = vpack.c.bf16 %v838_v25, %v837_v24  ;;  %v623_v35 = vld [vmem:[%s2172_s20 + $0x1a] sm:$0xff]  ;;  %v227_v42 = vld [vmem:[%s2172_s20 + $0x30] sm:$0xff] }
  0x20   : > { %1885 = vmatprep.subr.bf16.mxu0 %v2123_v4  ;;  %v225_v36 = vld [vmem:[%s2172_s20 + $0x20] sm:$0xff]  ;;  %v226_v38 = vld [vmem:[%s2172_s20 + $0x28] sm:$0xff]  ;;  %v1040_v41 = vld [vmem:[%s2588_s1 + $0x74] sm:$0xff]  ;;  %p2041_p9 = pneg %p2040_p8 }
  0x21   : > { %1668 = vmatmul.mubr.msk.f32.vlgmr.msra.gmra.mrb[0].mxu1 %vm236_vm5, %v221_v20  ;;  %v624_v37 = vld [vmem:[%s2172_s20 + $0x22] sm:$0xff]  ;;  %v625_v39 = vld [vmem:[%s2172_s20 + $0x2a] sm:$0xff]  ;;  %v826_v51 = vld [vmem:[%s2172_s20 + $0x13] sm:$0xff] }
  0x22   : > { %1750 = vmatmul.mubr.msk.f32.vlgmr.msra.gmra.mrb[0].mxu0 %vm236_vm5, %v620_v21  ;;  %1670 = vmatprep.mubr.msk.f32.mxu1 %vm2124_vm2, %v2125_v12  ;;  %v1039_v40 = vld [vmem:[%s2588_s1 + $0x6c] sm:$0xff]  ;;  %v824_v43 = vld [vmem:[%s2172_s20 + $0x3] sm:$0xff]  ;;  %v827_v53 = vld [vmem:[%s2172_s20 + $0x1b] sm:$0xff]  ;;  %p2048_p13 = pnand %p2047_p12, %p2041_p9 }
  0x23   : > { %1887 = vmatpush3.bf16.msra.mxu0 %v1886_v22  ;;  %1752 = vmatprep.mubr.msk.f32.mxu0 %vm2124_vm2, %v2125_v12  ;;  %v1893_v44 = vpack.c.bf16 %v1040_v41, %v1039_v40  ;;  %v1041_v45 = vld [vmem:[%s2588_s1 + $0x7c] sm:$0xff]  ;;  %v1042_v46 = vld [vmem:[%s2588_s1 + $0x84] sm:$0x7]  ;;  %v825_v48 = vld [vmem:[%s2172_s20 + $0xb] sm:$0xff] }
  0x24   : > { %1873 = vmatpush3.bf16.msra.mxu1 %v1872_v23  ;;  %1888 = vmatprep.subr.bf16.mxu0 %v2123_v4  ;;  %v1896_v49 = vpack.c.bf16 %v1042_v46, %v1041_v45  ;;  %v229_v50 = vld [vmem:[%s2172_s20 + $0x40] sm:$0xff]  ;;  %v230_v52 = vld [vmem:[%s2172_s20 + $0x48] sm:$0xff]  ;;  %v231_v54 = vld [vmem:[%s2172_s20 + $0x50] sm:$0xff] }
  0x25   : > { %1671 = vmatmul.mubr.msk.f32.gmra.mrb[2].mxu1 %vm236_vm5, %v222_v28  ;;  %1874 = vmatprep.subr.bf16.mxu1 %v2123_v4  ;;  %v828_v55 = vld [vmem:[%s2172_s20 + $0x23] sm:$0xff]  ;;  %v829_v57 = vld [vmem:[%s2172_s20 + $0x2b] sm:$0xff]  ;;  %v830_v59 = vld [vmem:[%s2172_s20 + $0x33] sm:$0xff] }
  0x26   : > { %1753 = vmatmul.mubr.msk.f32.gmra.mrb[2].mxu0 %vm236_vm5, %v621_v29  ;;  %1673 = vmatprep.mubr.msk.f32.mxu1 %vm2124_vm2, %v2125_v12  ;;  %v416_v56 = vld [vmem:[%s2172_s20 + $0x1] sm:$0xff]  ;;  %v417_v58 = vld [vmem:[%s2172_s20 + $0x9] sm:$0xff]  ;;  %v418_v60 = vld [vmem:[%s2172_s20 + $0x11] sm:$0xff] }
  0x27   : > { %1755 = vmatprep.mubr.msk.f32.mxu0 %vm2124_vm2, %v2125_v12  ;;  %1891 = vmatpush3.bf16.msk.msra.mxu0 %vm2209_vm4, %v1889_v30  ;;  %v831_v61 = vld [vmem:[%s2172_s20 + $0x3b] sm:$0xff]  ;;  %v832_v63 = vld [vmem:[%s2172_s20 + $0x43] sm:$0xff]  ;;  %v833_v1 = vld [vmem:[%s2172_s20 + $0x4b] sm:$0xff] }
  0x28   : > { %1892 = vmatprep.subr.bf16.mxu0 %v2123_v4  ;;  %1877 = vmatpush3.bf16.msk.msra.mxu1 %vm2209_vm4, %v1875_v31  ;;  %v419_v62 = vld [vmem:[%s2172_s20 + $0x19] sm:$0xff]  ;;  %v420_v0 = vld [vmem:[%s2172_s20 + $0x21] sm:$0xff]  ;;  %v421_v2 = vld [vmem:[%s2172_s20 + $0x29] sm:$0xff] }
  0x29   : > { %1674 = vmatmul.mubr.msk.f32.gmra.mrb[4].mxu1 %vm236_vm5, %v223_v32  ;;  %1899 = vmatprep.subr.bf16.mxu1 %v2123_v4  ;;  %v834_v3 = vld [vmem:[%s2172_s20 + $0x53] sm:$0xff]  ;;  %v1028_v5 = vld [vmem:[%s2172_s20 + $0x4] sm:$0xff]  ;;  %v1031_v11 = vld [vmem:[%s2172_s20 + $0x1c] sm:$0xff] }
  0x2a   : > { %1756 = vmatmul.mubr.msk.f32.gmra.mrb[4].mxu0 %vm236_vm5, %v622_v33  ;;  %1676 = vmatprep.mubr.msk.f32.mxu1 %vm2124_vm2, %v2125_v12  ;;  %v423_v6 = vld [vmem:[%s2172_s20 + $0x39] sm:$0xff]  ;;  %v1029_v7 = vld [vmem:[%s2172_s20 + $0xc] sm:$0xff]  ;;  %v424_v8 = vld [vmem:[%s2172_s20 + $0x41] sm:$0xff] }
  0x2b   : > { %1758 = vmatprep.mubr.msk.f32.mxu0 %vm2124_vm2, %v2125_v12  ;;  %v425_v10 = vld [vmem:[%s2172_s20 + $0x49] sm:$0xff]  ;;  %v426_v13 = vld [vmem:[%s2172_s20 + $0x51] sm:$0xff]  ;;  %v627_v17 = vld [vmem:[%s2172_s20 + $0x3a] sm:$0xff] }
  0x2c   : > { %v1032_v14 = vld [vmem:[%s2172_s20 + $0x24] sm:$0xff]  ;;  %v1033_v16 = vld [vmem:[%s2172_s20 + $0x2c] sm:$0xff]  ;;  %v1034_v18 = vld [vmem:[%s2172_s20 + $0x34] sm:$0xff] }
  0x2d   : > { %1677 = vmatmul.mubr.msk.f32.gmra.mrb[6].mxu1 %vm236_vm5, %v224_v34  ;;  %v628_v19 = vld [vmem:[%s2172_s20 + $0x42] sm:$0xff]  ;;  %v629_v21 = vld [vmem:[%s2172_s20 + $0x4a] sm:$0xff]  ;;  %v630_v23 = vld [vmem:[%s2172_s20 + $0x52] sm:$0xff] }
  0x2e   : > { %1759 = vmatmul.mubr.msk.f32.gmra.mrb[6].mxu0 %vm236_vm5, %v623_v35  ;;  %1679 = vmatprep.mubr.msk.f32.mxu1 %vm2124_vm2, %v2125_v12  ;;  %v1035_v20 = vld [vmem:[%s2172_s20 + $0x3c] sm:$0xff]  ;;  %v1036_v22 = vld [vmem:[%s2172_s20 + $0x44] sm:$0xff]  ;;  %v1037_v24 = vld [vmem:[%s2172_s20 + $0x4c] sm:$0xff] }
  0x2f   : > { %1761 = vmatprep.mubr.msk.f32.mxu0 %vm2124_vm2, %v2125_v12  ;;  %v1038_v25 = vld [vmem:[%s2172_s20 + $0x54] sm:$0xff] }
  0x31   : > { %1680 = vmatmul.mubr.msk.f32.gmra.mrb[8].mxu1 %vm236_vm5, %v225_v36 }
  0x32   : > { %1762 = vmatmul.mubr.msk.f32.gmra.mrb[8].mxu0 %vm236_vm5, %v624_v37  ;;  %1682 = vmatprep.mubr.msk.f32.mxu1 %vm2124_vm2, %v2125_v12 }
  0x33   : > { %1764 = vmatprep.mubr.msk.f32.mxu0 %vm2124_vm2, %v2125_v12 }
  0x35   : > { %1683 = vmatmul.mubr.msk.f32.gmra.mrb[10].mxu1 %vm236_vm5, %v226_v38 }
  0x36   : > { %1765 = vmatmul.mubr.msk.f32.gmra.mrb[10].mxu0 %vm236_vm5, %v625_v39  ;;  %1685 = vmatprep.mubr.msk.f32.mxu1 %vm2124_vm2, %v2125_v12 }
  0x37   : > { %1790 = vmatprep.mubr.msk.f32.mxu0 %vm2124_vm2, %v2125_v12 }
  0x39   : > { %1686 = vmatmul.mubr.msk.f32.gmra.mrb[12].mxu1 %vm236_vm5, %v227_v42 }
  0x3a   : > { %1791 = vmatmul.mubr.msk.f32.vlgmr.msra.gmra.mrb[0].mxu0 %vm236_vm5, %v824_v43  ;;  %1688 = vmatprep.mubr.msk.f32.mxu1 %vm2124_vm2, %v2125_v12 }
  0x3b   : > { %1894 = vmatpush3.bf16.msra.mxu0 %v1893_v44  ;;  %1793 = vmatprep.mubr.msk.f32.mxu0 %vm2124_vm2, %v2125_v12 }
  0x3c   : > { %1895 = vmatprep.subr.bf16.mxu0 %v2123_v4 }
  0x3d   : > { %1689 = vmatmul.mubr.msk.f32.gmra.mrb[14].mxu1 %vm236_vm5, %v228_v47 }
  0x3e   : > { %1794 = vmatmul.mubr.msk.f32.gmra.mrb[2].mxu0 %vm236_vm5, %v825_v48  ;;  %1691 = vmatprep.mubr.msk.f32.mxu1 %vm2124_vm2, %v2125_v12 }
  0x3f   : > { %1796 = vmatprep.mubr.msk.f32.mxu0 %vm2124_vm2, %v2125_v12  ;;  %1898 = vmatpush3.bf16.msk.msra.mxu0 %vm2209_vm4, %v1896_v49 }
  0x41   : > { %1692 = vmatmul.mubr.msk.f32.gmra.mrb[16].mxu1 %vm236_vm5, %v229_v50 }
  0x42   : > { %1797 = vmatmul.mubr.msk.f32.gmra.mrb[4].mxu0 %vm236_vm5, %v826_v51  ;;  %1694 = vmatprep.mubr.msk.f32.mxu1 %vm2124_vm2, %v2125_v12 }
  0x43   : > { %1799 = vmatprep.mubr.msk.f32.mxu0 %vm2124_vm2, %v2125_v12 }
  0x45   : > { %1695 = vmatmul.mubr.msk.f32.gmra.mrb[18].mxu1 %vm236_vm5, %v230_v52 }
  0x46   : > { %1800 = vmatmul.mubr.msk.f32.gmra.mrb[6].mxu0 %vm236_vm5, %v827_v53  ;;  %1697 = vmatprep.mubr.msk.f32.mxu1 %vm2124_vm2, %v2125_v12 }
  0x47   : > { %1802 = vmatprep.mubr.msk.f32.mxu0 %vm2124_vm2, %v2125_v12 }
  0x49   : > { %1698 = vmatmul.mubr.msk.f32.gmra.mrb[20].mxu1 %vm236_vm5, %v231_v54 }
  0x4a   : > { %1803 = vmatmul.mubr.msk.f32.gmra.mrb[8].mxu0 %vm236_vm5, %v828_v55  ;;  %1708 = vmatprep.mubr.msk.f32.mxu1 %vm2124_vm2, %v2125_v12 }
  0x4b   : > { %1805 = vmatprep.mubr.msk.f32.mxu0 %vm2124_vm2, %v2125_v12 }
  0x4d   : > { %1709 = vmatmul.mubr.msk.f32.vlgmr.msra.gmra.mrb[0].mxu1 %vm236_vm5, %v416_v56 }
  0x4e   : > { %1806 = vmatmul.mubr.msk.f32.gmra.mrb[12].mxu0 %vm236_vm5, %v829_v57  ;;  %1711 = vmatprep.mubr.msk.f32.mxu1 %vm2124_vm2, %v2125_v12 }
  0x4f   : > { %1808 = vmatprep.mubr.msk.f32.mxu0 %vm2124_vm2, %v2125_v12  ;;  %1901 = vmatpush3.bf16.msra.mxu1 %v2194_v9  ;;  %v1030_v9 = vld [vmem:[%s2172_s20 + $0x14] sm:$0xff] }
  0x50   : > { %1900 = vmatprep.subr.bf16.mxu1 %v2123_v4  ;;  %v422_v4 = vld [vmem:[%s2172_s20 + $0x31] sm:$0xff] }
  0x51   : > { %1712 = vmatmul.mubr.msk.f32.gmra.mrb[2].mxu1 %vm236_vm5, %v417_v58 }
  0x52   : > { %1809 = vmatmul.mubr.msk.f32.gmra.mrb[14].mxu0 %vm236_vm5, %v830_v59  ;;  %1714 = vmatprep.mubr.msk.f32.mxu1 %vm2124_vm2, %v2125_v12 }
  0x53   : > { %1811 = vmatprep.mubr.msk.f32.mxu0 %vm2124_vm2, %v2125_v12  ;;  %1902 = vmatpush3.bf16.msk.msra.mxu1 %vm2209_vm4, %v2213_v15  ;;  %v626_v15 = vld [vmem:[%s2172_s20 + $0x32] sm:$0xff]  ;;  %s2127_s20 = smov 72  }
  0x55   : > { %1715 = vmatmul.mubr.msk.f32.gmra.mrb[4].mxu1 %vm236_vm5, %v418_v60 }
  0x56   : > { %1812 = vmatmul.mubr.msk.f32.gmra.mrb[16].mxu0 %vm236_vm5, %v831_v61  ;;  %1717 = vmatprep.mubr.msk.f32.mxu1 %vm2124_vm2, %v2125_v12 }
  0x57   : > { %1814 = vmatprep.mubr.msk.f32.mxu0 %vm2124_vm2, %v2125_v12 }
  0x59   : > { %1718 = vmatmul.mubr.msk.f32.gmra.mrb[6].mxu1 %vm236_vm5, %v419_v62 }
  0x5a   : > { %1815 = vmatmul.mubr.msk.f32.gmra.mrb[18].mxu0 %vm236_vm5, %v832_v63  ;;  %1720 = vmatprep.mubr.msk.f32.mxu1 %vm2124_vm2, %v2125_v12 }
  0x5b   : > { %1817 = vmatprep.mubr.msk.f32.mxu0 %vm2124_vm2, %v2125_v12 }
  0x5d   : > { %1721 = vmatmul.mubr.msk.f32.gmra.mrb[8].mxu1 %vm236_vm5, %v420_v0 }
  0x5e   : > { %1818 = vmatmul.mubr.msk.f32.gmra.mrb[20].mxu0 %vm236_vm5, %v833_v1  ;;  %1723 = vmatprep.mubr.msk.f32.mxu1 %vm2124_vm2, %v2125_v12 }
  0x5f   : > { %1820 = vmatprep.mubr.msk.f32.mxu0 %vm2124_vm2, %v2125_v12 }
  0x61   : > { %1724 = vmatmul.mubr.msk.f32.gmra.mrb[22].mxu1 %vm236_vm5, %v421_v2 }
  0x62   : > { %1821 = vmatmul.mubr.msk.f32.gmra.mrb[22].mxu0 %vm236_vm5, %v834_v3  ;;  %1726 = vmatprep.mubr.msk.f32.mxu1 %vm2124_vm2, %v2125_v12 }
  0x63   : > { %1831 = vmatprep.mubr.msk.f32.mxu0 %vm2124_vm2, %v2125_v12 }
  0x65   : > { %1727 = vmatmul.mubr.msk.f32.gmra.mrb[12].mxu1 %vm236_vm5, %v422_v4 }
  0x66   : > { %1832 = vmatmul.mubr.msk.f32.vlgmr.msra.gmra.mrb[0].mxu0 %vm236_vm5, %v1028_v5  ;;  %1729 = vmatprep.mubr.msk.f32.mxu1 %vm2124_vm2, %v2125_v12 }
  0x67   : > { %1834 = vmatprep.mubr.msk.f32.mxu0 %vm2124_vm2, %v2125_v12 }
  0x69   : > { %1730 = vmatmul.mubr.msk.f32.gmra.mrb[14].mxu1 %vm236_vm5, %v423_v6 }
  0x6a   : > { %1835 = vmatmul.mubr.msk.f32.gmra.mrb[2].mxu0 %vm236_vm5, %v1029_v7  ;;  %1732 = vmatprep.mubr.msk.f32.mxu1 %vm2124_vm2, %v2125_v12 }
  0x6b   : > { %1837 = vmatprep.mubr.msk.f32.mxu0 %vm2124_vm2, %v2125_v12 }
  0x6d   : > { %1733 = vmatmul.mubr.msk.f32.gmra.mrb[16].mxu1 %vm236_vm5, %v424_v8 }
  0x6e   : > { %1838 = vmatmul.mubr.msk.f32.gmra.mrb[4].mxu0 %vm236_vm5, %v1030_v9  ;;  %1735 = vmatprep.mubr.msk.f32.mxu1 %vm2124_vm2, %v2125_v12 }
  0x6f   : > { %1840 = vmatprep.mubr.msk.f32.mxu0 %vm2124_vm2, %v2125_v12 }
  0x71   : > { %1736 = vmatmul.mubr.msk.f32.gmra.mrb[18].mxu1 %vm236_vm5, %v425_v10 }
  0x72   : > { %1841 = vmatmul.mubr.msk.f32.gmra.mrb[6].mxu0 %vm236_vm5, %v1031_v11  ;;  %1738 = vmatprep.mubr.msk.f32.mxu1 %vm2124_vm2, %v2125_v12 }
  0x73   : > { %1843 = vmatprep.mubr.msk.f32.mxu0 %vm2124_vm2, %v2125_v12 }
  0x75   : > { %1739 = vmatmul.mubr.msk.f32.gmra.mrb[20].mxu1 %vm236_vm5, %v426_v13 }
  0x76   : > { %1844 = vmatmul.mubr.msk.f32.gmra.mrb[8].mxu0 %vm236_vm5, %v1032_v14  ;;  %1767 = vmatprep.mubr.msk.f32.mxu1 %vm2124_vm2, %v2125_v12 }
  0x77   : > { %1846 = vmatprep.mubr.msk.f32.mxu0 %vm2124_vm2, %v2125_v12 }
  0x79   : > { %1768 = vmatmul.mubr.msk.f32.vlgmr.msra.gmra.mrb[12].mxu1 %vm236_vm5, %v626_v15 }
  0x7a   : > { %1847 = vmatmul.mubr.msk.f32.gmra.mrb[24].mxu0 %vm236_vm5, %v1033_v16  ;;  %1770 = vmatprep.mubr.msk.f32.mxu1 %vm2124_vm2, %v2125_v12 }
  0x7b   : > { %1849 = vmatprep.mubr.msk.f32.mxu0 %vm2124_vm2, %v2125_v12 }
  0x7d   : > { %1771 = vmatmul.mubr.msk.f32.gmra.mrb[14].mxu1 %vm236_vm5, %v627_v17 }
  0x7e   : > { %1850 = vmatmul.mubr.msk.f32.gmra.mrb[14].mxu0 %vm236_vm5, %v1034_v18  ;;  %1773 = vmatprep.mubr.msk.f32.mxu1 %vm2124_vm2, %v2125_v12 }
  0x7f   : > { %1852 = vmatprep.mubr.msk.f32.mxu0 %vm2124_vm2, %v2125_v12 }
  0x81   : > { %1774 = vmatmul.mubr.msk.f32.gmra.mrb[16].mxu1 %vm236_vm5, %v628_v19 }
  0x82   : > { %1853 = vmatmul.mubr.msk.f32.gmra.mrb[16].mxu0 %vm236_vm5, %v1035_v20  ;;  %1776 = vmatprep.mubr.msk.f32.mxu1 %vm2124_vm2, %v2125_v12 }
  0x83   : > { %1855 = vmatprep.mubr.msk.f32.mxu0 %vm2124_vm2, %v2125_v12 }
  0x85   : > { %1777 = vmatmul.mubr.msk.f32.gmra.mrb[18].mxu1 %vm236_vm5, %v629_v21 }
  0x86   : > { %1856 = vmatmul.mubr.msk.f32.gmra.mrb[18].mxu0 %vm236_vm5, %v1036_v22  ;;  %1779 = vmatprep.mubr.msk.f32.mxu1 %vm2124_vm2, %v2125_v12 }
  0x87   : > { %1858 = vmatprep.mubr.msk.f32.mxu0 %vm2124_vm2, %v2125_v12 }
  0x89   : > { %1780 = vmatmul.mubr.msk.f32.gmra.mrb[20].mxu1 %vm236_vm5, %v630_v23 }
  0x8a   : > { %1859 = vmatmul.mubr.msk.f32.gmra.mrb[20].mxu0 %vm236_vm5, %v1037_v24 }
  0x8b   : > { %1861 = vmatprep.mubr.msk.f32.mxu0 %vm2124_vm2, %v2125_v12 }
  0x8e   : > { %1862 = vmatmul.mubr.msk.f32.gmra.mrb[22].mxu0 %vm236_vm5, %v1038_v25 }
 0x108   : > { %v365_v26 = vpop.f32.mrb[10].mxu1 }
 0x109   : > { %v762_v27 = vpop.f32.mrb[10].mxu0  ;;  %v1684_v28 = vpop.f32.mrb[11].mxu1 }
 0x10a   : > { %v1766_v29 = vpop.f32.mrb[11].mxu0 }
 0x120   : > { %v533_v30 = vpop.f32.mrb[0].mxu1 }
 0x121   : > { %v966_v31 = vpop.f32.mrb[12].mxu0  ;;  %v1710_v32 = vpop.f32.mrb[1].mxu1 }
 0x122   : > { %v1807_v33 = vpop.f32.mrb[13].mxu0 }
 0x124   : > { %v538_v34 = vpop.f32.mrb[2].mxu1 }
 0x125   : > { %v1713_v35 = vpop.f32.mrb[3].mxu1 }
 0x128   : > { %v543_v36 = vpop.f32.mrb[4].mxu1 }
 0x129   : > { %v1716_v37 = vpop.f32.mrb[5].mxu1 }
 0x12c   : > { %v548_v38 = vpop.f32.mrb[6].mxu1 }
 0x12d   : > { %v1719_v39 = vpop.f32.mrb[7].mxu1 }
 0x130   : > { %v553_v40 = vpop.f32.mrb[8].mxu1 }
 0x131   : > { %v1722_v41 = vpop.f32.mrb[9].mxu1 }
 0x134   : > { %v558_v12 = vpop.f32.mrb[22].mxu1 }
 0x135   : > { %v1725_v42 = vpop.f32.mrb[23].mxu1 }
 0x139   : > { %v1145_v43 = vpop.f32.mrb[0].mxu0 }
 0x13a   : > { %v1903_v44 = vadd.f32 %v1145_v43, %v533_v30  ;;  %v1833_v45 = vpop.f32.mrb[1].mxu0 }
 0x13c   : > { %v2491_v46 = vmul.f32 %v1903_v44, %v1903_v44 }
 0x13d   : > { %v1150_v47 = vpop.f32.mrb[2].mxu0 }
 0x13e   : > { %v1904_v48 = vadd.f32 %v1150_v47, %v538_v34  ;;  %v1836_v49 = vpop.f32.mrb[3].mxu0  ;;  %1241 = vrot.lane.b32.xlu0 %v2491_v46, %s2127_s20 }
 0x140   : > { %v1232_v50 = vmul.f32 %v1904_v48, %v1904_v48 }
 0x141   : > { %v1155_v51 = vpop.f32.mrb[4].mxu0 }
 0x142   : > { %v1905_v52 = vadd.f32 %v1155_v51, %v543_v36  ;;  %v1839_v53 = vpop.f32.mrb[5].mxu0  ;;  %1243 = vrot.lane.b32.xlu0 %v1232_v50, %s2127_s20  ;;  %v1352_v51 = vlaneseq }
 0x144   : > { %v1233_v54 = vmul.f32 %v1905_v52, %v1905_v52 }
 0x145   : > { %v1160_v55 = vpop.f32.mrb[6].mxu0 }
 0x146   : > { %v1906_v56 = vadd.f32 %v1160_v55, %v548_v38  ;;  %v1842_v57 = vpop.f32.mrb[7].mxu0  ;;  %1245 = vrot.lane.b32.xlu0 %v1233_v54, %s2127_s20 }
 0x148   : > { %v1234_v58 = vmul.f32 %v1906_v56, %v1906_v56 }
 0x149   : > { %v1165_v59 = vpop.f32.mrb[8].mxu0 }
 0x14a   : > { %v1907_v60 = vadd.f32 %v1165_v59, %v553_v40  ;;  %v1845_v61 = vpop.f32.mrb[9].mxu0  ;;  %1247 = vrot.lane.b32.xlu0 %v1234_v58, %s2127_s20 }
 0x14b   : > { %v1353_v61 = vshrl.u32 %v1352_v51, 7 }
 0x14c   : > { %v2498_v62 = vmul.f32 %v1907_v60, %v1907_v60  ;;  %v767_v63 = vpop.f32.mrb[12].mxu1 }
 0x14d   : > { %v1170_v0 = vpop.f32.mrb[24].mxu0  ;;  %v1769_v1 = vpop.f32.mrb[13].mxu1 }
 0x14e   : > { %v1848_v2 = vpop.f32.mrb[25].mxu0  ;;  %1249 = vrot.lane.b32.xlu0 %v2498_v62, %s2127_s20 }
 0x150   : > { %v772_v3 = vpop.f32.mrb[14].mxu1 }
 0x151   : > { %v1175_v4 = vpop.f32.mrb[14].mxu0  ;;  %v1772_v5 = vpop.f32.mrb[15].mxu1 }
 0x152   : > { %v1908_v6 = vadd.f32 %v1175_v4, %v767_v63  ;;  %v1851_v7 = vpop.f32.mrb[15].mxu0 }
 0x154   : > { %v1261_v8 = vmul.f32 %v1908_v6, %v1908_v6  ;;  %v777_v9 = vpop.f32.mrb[16].mxu1  ;;  %v2510_v6 = vadd.s32 32, %v1353_v61 }
 0x155   : > { %v1180_v10 = vpop.f32.mrb[16].mxu0  ;;  %v1775_v11 = vpop.f32.mrb[17].mxu1 }
 0x156   : > { %v1909_v13 = vadd.f32 %v1180_v10, %v772_v3  ;;  %v1854_v14 = vpop.f32.mrb[17].mxu0  ;;  %1271 = vrot.lane.b32.xlu1 %v1261_v8, %s2127_s20  ;;  %vm1368_vm7 = vcmp.lt.s32.totalorder %v2510_v6, 38 }
 0x158   : > { %v1262_v15 = vmul.f32 %v1909_v13, %v1909_v13  ;;  %v782_v16 = vpop.f32.mrb[18].mxu1 }
 0x159   : > { %v1185_v17 = vpop.f32.mrb[18].mxu0  ;;  %v1778_v18 = vpop.f32.mrb[19].mxu1 }
 0x15a   : > { %v1910_v19 = vadd.f32 %v1185_v17, %v777_v9  ;;  %v1857_v20 = vpop.f32.mrb[19].mxu0  ;;  %1273 = vrot.lane.b32.xlu1 %v1262_v15, %s2127_s20 }
 0x15c   : > { %v1263_v21 = vmul.f32 %v1910_v19, %v1910_v19  ;;  %v787_v22 = vpop.f32.mrb[20].mxu1 }
 0x15d   : > { %v1190_v23 = vpop.f32.mrb[20].mxu0  ;;  %v1781_v24 = vpop.f32.mrb[21].mxu1 }
 0x15e   : > { %v1911_v25 = vadd.f32 %v1190_v23, %v782_v16  ;;  %v1860_v26 = vpop.f32.mrb[21].mxu0  ;;  %1275 = vrot.lane.b32.xlu1 %v1263_v21, %s2127_s20 }
 0x160   : > { %v1264_v27 = vmul.f32 %v1911_v25, %v1911_v25 }
 0x161   : > { %v1195_v28 = vpop.f32.mrb[22].mxu0 }
 0x162   : > { %v1912_v29 = vadd.f32 %v1195_v28, %v787_v22  ;;  %v1863_v30 = vpop.f32.mrb[23].mxu0  ;;  %1277 = vrot.lane.b32.xlu1 %v1264_v27, %s2127_s20 }
 0x164   : > { %v1265_v31 = vmul.f32 %v1912_v29, %v1912_v29 }
 0x166   : > { %1279 = vrot.lane.b32.xlu1 %v1265_v31, %s2127_s20 }
 0x1b0   : > { %v1242_v32 = vpop.permute.xlu0 %1241 }
 0x1b1   : > { %v1256_v36 = vadd.f32 %v1242_v32, %v2491_v46 }
 0x1b3   : > { %v1301_v12 = vadd.f32 1e-07, %v1256_v36 }
 0x1b4   : > { %v1244_v33 = vpop.permute.xlu0 %1243 }
 0x1b5   : > { %v1257_v35 = vadd.f32 %v1244_v33, %v1232_v50 }
 0x1b7   : > { %v1302_v40 = vadd.f32 1e-07, %v1257_v35 }
 0x1b8   : > { %v1246_v34 = vpop.permute.xlu0 %1245 }
 0x1b9   : > { %v1258_v38 = vadd.f32 %v1246_v34, %v1233_v54  ;;  %2018 = vlog2.f32 %v1302_v40 }
 0x1bb   : > { %v1303_v43 = vadd.f32 1e-07, %v1258_v38 }
 0x1bc   : > { %v1248_v37 = vpop.permute.xlu0 %1247 }
 0x1bd   : > { %v1259_v44 = vadd.f32 %v1248_v37, %v1234_v58 }
 0x1bf   : > { %v1304_v50 = vadd.f32 1e-07, %v1259_v44 }
 0x1c0   : > { %v1250_v47 = vpop.permute.xlu0 %1249 }
 0x1c1   : > { %v1260_v46 = vadd.f32 %v1250_v47, %v2498_v62 }
 0x1c3   : > { %v1305_v58 = vadd.f32 1e-07, %v1260_v46  ;;  %v2019_v2 = vpop.eup %2018 }
 0x1c4   : > { %v1309_v13 = vmul.f32 0.6931472, %v2019_v2 }
 0x1c6   : > { %v1318_v30 = vmul.f32 1.442695, %v1309_v13 }
 0x1c8   : > { %v1272_v39 = vpop.permute.xlu1 %1271 }
 0x1c9   : > { %v1286_v41 = vadd.f32 %v1272_v39, %v1261_v8 }
 0x1cb   : > { %v1322_v42 = vadd.f32 1e-07, %v1286_v41  ;;  %v1291_v55 = vsub.f32 %v1286_v41, %v1256_v36  ;;  %v1389_v36 = vld [vmem:[#allocation3] sm:$0xff] }
 0x1cc   : > { %v1274_v45 = vpop.permute.xlu1 %1273 }
 0x1cd   : > { %v1287_v48 = vadd.f32 %v1274_v45, %v1262_v15  ;;  %2020 = vlog2.f32 %v1322_v42  ;;  %v1296_v0 = vand.u32 2147483647, %v1291_v55 }
 0x1ce   : > { %2022 = vlog2.f32 %v1301_v12 }
 0x1cf   : > { %v1323_v49 = vadd.f32 1e-07, %v1287_v48  ;;  %2024 = vlog2.f32 %v1303_v43  ;;  %v1292_v52 = vsub.f32 %v1287_v48, %v1257_v35  ;;  %v1391_v14 = vsel %vm1390_vm6, %v1296_v0, 0.0 }
 0x1d0   : > { %v1276_v53 = vpop.permute.xlu1 %1275 }
 0x1d1   : > { %2026 = vlog2.f32 %v1323_v49  ;;  %v1288_v54 = vadd.f32 %v1276_v53, %v1263_v21  ;;  %v1297_v59 = vand.u32 2147483647, %v1292_v52 }
 0x1d2   : > { %2028 = vlog2.f32 %v1304_v50 }
 0x1d3   : > { %v1293_v56 = vsub.f32 %v1288_v54, %v1258_v38  ;;  %v1324_v57 = vadd.f32 1e-07, %v1288_v54  ;;  %v1392_v5 = vsel %vm1390_vm6, %v1297_v59, 0.0 }
 0x1d4   : > { %v1278_v60 = vpop.permute.xlu1 %1277  ;;  %v1393_v18 = vadd.f32 %v1392_v5, %v1391_v14 }
 0x1d5   : > { %2030 = vlog2.f32 %v1324_v57  ;;  %v1289_v63 = vadd.f32 %v1278_v60, %v1264_v27  ;;  %v1298_v1 = vand.u32 2147483647, %v1293_v56 }
 0x1d6   : > { %2032 = vlog2.f32 %v1305_v58 }
 0x1d7   : > { %v1294_v3 = vsub.f32 %v1289_v63, %v1259_v44  ;;  %v1325_v62 = vadd.f32 1e-07, %v1289_v63  ;;  %v2021_v4 = vpop.eup %2020  ;;  %v1394_v15 = vsel %vm1390_vm6, %v1298_v1, 0.0 }
 0x1d8   : > { %v1280_v7 = vpop.permute.xlu1 %1279  ;;  %v2023_v8 = vpop.eup %2022  ;;  %v1328_v17 = vmul.f32 0.6931472, %v2021_v4  ;;  %v1395_v24 = vadd.f32 %v1394_v15, %v1393_v18 }
 0x1d9   : > { %v1299_v9 = vand.u32 2147483647, %v1294_v3  ;;  %2034 = vlog2.f32 %v1325_v62  ;;  %v1290_v10 = vadd.f32 %v1280_v7, %v1265_v31  ;;  %v2025_v11 = vpop.eup %2024  ;;  %v1307_v23 = vmul.f32 0.6931472, %v2023_v8 }
 0x1da   : > { %v1311_v27 = vmul.f32 0.6931472, %v2025_v11  ;;  %v1337_v31 = vmul.f32 1.442695, %v1328_v17 }
 0x1db   : > { %v2027_v16 = vpop.eup %2026  ;;  %v1295_v19 = vsub.f32 %v1290_v10, %v1260_v46  ;;  %v1326_v20 = vadd.f32 1e-07, %v1290_v10  ;;  %v1396_v22 = vsel %vm1390_vm6, %v1299_v9, 0.0  ;;  %v1317_v37 = vmul.f32 1.442695, %v1307_v23 }
 0x1dc   : > { %v1330_v21 = vmul.f32 0.6931472, %v2027_v16  ;;  %v2029_v26 = vpop.eup %2028  ;;  %v1397_v32 = vadd.f32 %v1396_v22, %v1395_v24  ;;  %v1319_v12 = vmul.f32 1.442695, %v1311_v27 }
 0x1dd   : > { %v1300_v25 = vand.u32 2147483647, %v1295_v19  ;;  %2036 = vlog2.f32 %v1326_v20  ;;  %v1313_v38 = vmul.f32 0.6931472, %v2029_v26  ;;  %v1342_v44 = vsub.f32 %v1317_v37, %v1337_v31 }
 0x1de   : > { %v1338_v28 = vmul.f32 1.442695, %v1330_v21 }
 0x1df   : > { %v2031_v29 = vpop.eup %2030  ;;  %v1383_v33 = vsel %vm1368_vm7, %v1300_v25, 0.0  ;;  %v1320_v49 = vmul.f32 1.442695, %v1313_v38 }
 0x1e0   : > { %v1332_v34 = vmul.f32 0.6931472, %v2031_v29  ;;  %v1398_v35 = vsel %vm1390_vm6, %v1383_v33, 0.0  ;;  %v1343_v39 = vsub.f32 %v1318_v30, %v1338_v28  ;;  %v2033_v41 = vpop.eup %2032 }
 0x1e1   : > { %v1399_v40 = vadd.f32 %v1398_v35, %v1397_v32  ;;  %v1315_v50 = vmul.f32 0.6931472, %v2033_v41 }
 0x1e2   : > { %v1339_v42 = vmul.f32 1.442695, %v1332_v34  ;;  %v1348_v51 = vand.u32 2147483647, %v1343_v39 }
 0x1e3   : > { %v2035_v43 = vpop.eup %2034  ;;  %v1400_v45 = vadd.f32 %v1399_v40, %v1389_v36 }
 0x1e4   : > { %v1344_v47 = vsub.f32 %v1319_v12, %v1339_v42  ;;  %v1334_v48 = vmul.f32 0.6931472, %v2035_v43 }
 0x1e5   : > { %1401 = vst.msk [vmem:[#allocation3] sm:$0xff] %vm1390_vm6, %v1400_v45 }
 0x1e6   : > { %v1340_v46 = vmul.f32 1.442695, %v1334_v48 }
 0x1e7   : > { %2051 = shalt.err (!%p2048_p13)
}
 0x1e8   : > { %s2052_s22 = scalar_lea.hbm %s2589_s2, 128 }
 0x1e9   : > { %p2053_p0 = scmp.ne.s32.totalorder %s2589_s2, %s2052_s22  ;;  %p2058_p3 = scmp.lt.u32.totalorder %s2052_s22, %s2589_s2 }
 0x1eb   : > { %p2054_p1 = pnand %p2053_p0, %p2521_p6 }
 0x1ed   : > { %p2055_p2 = pneg %p2054_p1 }
 0x1ef   : > { %p2060_p4 = pnand %p2058_p3, %p2055_p2 }
 0x1f1   : > { %2063 = shalt.err (!%p2060_p4)
}
 0x1f2   : > { %1975 = dma.vmem_to_hbm [thread:$0]  (%p2521_p6), %s1424_s17, 128, %s2589_s2, [#allocation4]   ;;  %v2037_v52 = vpop.eup %2036  ;;  %v1347_v53 = vand.u32 2147483647, %v1342_v44  ;;  %v1349_v54 = vand.u32 2147483647, %v1344_v47  ;;  %v1345_v55 = vsub.f32 %v1320_v49, %v1340_v46 }
 0x1f3   : > { %v1336_v56 = vmul.f32 0.6931472, %v2037_v52  ;;  %v1404_v57 = vsel %vm1390_vm6, %v1348_v51, 0.0  ;;  %v1321_v58 = vmul.f32 1.442695, %v1315_v50  ;;  %v1402_v7 = vld [vmem:[#allocation5] sm:$0xff] }
 0x1f4   : > { %v1350_v59 = vand.u32 2147483647, %v1345_v55  ;;  %v1403_v61 = vsel %vm1390_vm6, %v1347_v53, 0.0  ;;  %v1406_v63 = vsel %vm1390_vm6, %v1349_v54, 0.0  ;;  %s2129_s29 = smov [#allocation5]  }
 0x1f5   : > { %v1341_v60 = vmul.f32 1.442695, %v1336_v56  ;;  %v1405_v0 = vadd.f32 %v1404_v57, %v1403_v61  ;;  %s1436_s30 = sshll.u32 %s2129_s29, 4  ;;  %s1437_s30 = int_to_ptr.vmem [resolvable:$true] %s1436_s30 }
 0x1f6   : > { %v1408_v2 = vsel %vm1390_vm6, %v1350_v59, 0.0  ;;  %s2064_s4 = scalar_lea.vmem %s1437_s30, 128  ;;  %p2071_p9 = scmp.lt.s32.totalorder %s1437_s30, %s1437_s30 }
 0x1f7   : > { %v1346_v1 = vsub.f32 %v1321_v58, %v1341_v60  ;;  %v1407_v62 = vadd.f32 %v1406_v63, %v1405_v0  ;;  %p2065_p5 = scmp.ne.s32.totalorder %s1437_s30, %s2064_s4  ;;  %p2072_p10 = scmp.lt.s32.totalorder %s2064_s4, %s2064_s4 }
 0x1f9   : > { %v1351_v3 = vand.u32 2147483647, %v1346_v1  ;;  %v1409_v5 = vadd.f32 %v1408_v2, %v1407_v62  ;;  %p2066_p7 = pnand %p2065_p5, %p2521_p6  ;;  %p2073_p11 = por %p2072_p10, %p2071_p9 }
 0x1fb   : > { %v1388_v4 = vsel %vm1368_vm7, %v1351_v3, 0.0  ;;  %p2067_p8 = pneg %p2066_p7 }
 0x1fc   : > { %v1410_v8 = vsel %vm1390_vm6, %v1388_v4, 0.0 }
 0x1fd   : > { %v1411_v9 = vadd.f32 %v1410_v8, %v1409_v5  ;;  %p2074_p12 = pnand %p2073_p11, %p2067_p8 }
 0x1ff   : > { %v1412_v10 = vadd.f32 %v1411_v9, %v1402_v7 }
 0x201   : > { %1413 = vst.msk [vmem:[#allocation5] sm:$0xff] %vm1390_vm6, %v1412_v10 }
 0x202   : > { %2077 = shalt.err (!%p2074_p12)
}
 0x203   : > { %s2078_s7 = scalar_lea.hbm %s2590_s3, 128 }
 0x204   : > { %p2079_p13 = scmp.ne.s32.totalorder %s2590_s3, %s2078_s7  ;;  %p2084_p2 = scmp.lt.u32.totalorder %s2078_s7, %s2590_s3 }
 0x206   : > { %p2080_p0 = pnand %p2079_p13, %p2521_p6 }
 0x208   : > { %p2081_p1 = pneg %p2080_p0 }
 0x20a   : > { %p2086_p3 = pnand %p2084_p2, %p2081_p1 }
 0x20c   : > { %2089 = shalt.err (!%p2086_p3)
}
 0x20d   : > { %1977 = dma.vmem_to_hbm [thread:$0]  (%p2521_p6), %s1437_s30, 128, %s2590_s3, [#allocation6]  }
 0x20e   : > { %2103 = dma.done.wait (%p2521_p6), [#allocation4], 128  }
 0x20f   : > { %2105 = vsyncadd (%p2521_p6), [#allocation4], 4294967168 }
 0x210   : > { %2107 = dma.done.wait (%p2521_p6), [#allocation6], 128  }
 0x211   : > { %2109 = vsyncadd (%p2521_p6), [#allocation6], 4294967168 }
 0x212 PF: > { %s16_s14 = sadd.s32 1, %s2120_s14   ;;  %s2594_s12 = smov %s2116_s13 }
 0x213   : > { %p13_p4 = scmp.ge.s32.totalorder %s16_s14, 4   ;;  %s2595_s13 = smov %s2597_s16 }
 0x215   :  { %15 = sbr.rel (!%p13_p4) target bundleno = 3 (0x3), region = 73 }
 0x21c   :  { %1453 = vsyncpa [#allocation4], 1 }
 0x21d   :  { %1455 = vsyncpa [#allocation4 + $0x1], 1 }
 0x21e   :  { %1456 = vsyncpa [#allocation6], 1 }

</bundles_post_ra>
